<compile_context>
chip_gen: v7x
topology: tpu7x:2x2x1
jax: 0.10.0
libtpu: 0.0.40
codegen_flags: <defaults>
</compile_context>

<pallas_src>
import functools
import math

import jax
import jax.numpy as jnp
from jax.experimental import pallas as pl
from jax.experimental.pallas import tpu as pltpu


_VMEM_LIMIT = 48 * 1024 * 1024   # fits v5e (16 MiB scoped default) and v7x (64 MiB phys)


# ----------------------------------------------------------------------------
# helpers
# ----------------------------------------------------------------------------
def _pick_tile(dim, target, align):
    """Largest `align`-multiple divisor of `dim` that is <= target, else dim.

    The chosen tile is either the full dimension or an aligned multiple
    (sublane=8 / lane=128), keeping Mosaic's (8,128) layout rules.
    """
    if dim <= target:
        return dim
    t = (target // align) * align
    while t >= align:
        if dim % t == 0:
            return t
        t -= align
    return dim


def _gelu(y):
    # TODO(synk): HF BERT uses the erf GELU; tanh approximation used here.
    c = 0.7978845608028654  # sqrt(2/pi)
    return 0.5 * y * (1.0 + jnp.tanh(c * (y + 0.044715 * y * y * y)))


# ----------------------------------------------------------------------------
# tiled dense:  y = x @ W + b      (bf16 inputs, f32 accumulate)
# ----------------------------------------------------------------------------
def _dense_kernel(x_ref, w_ref, b_ref, o_ref, acc_ref):
    k = pl.program_id(2)

    @pl.when(k == 0)
    def _():
        acc_ref[...] = jnp.zeros_like(acc_ref)

    acc_ref[...] += jnp.dot(x_ref[...], w_ref[...],
                            preferred_element_type=jnp.float32)

    @pl.when(k == pl.num_programs(2) - 1)
    def _():
        o_ref[...] = (acc_ref[...] + b_ref[...]).astype(o_ref.dtype)


def dense(x, w, b, out_dtype=jnp.bfloat16, tm=512, tn=512, tk=1024):
    M, K = x.shape
    K2, N = w.shape
    assert K == K2 and b.shape == (1, N)
    tm = _pick_tile(M, tm, 8)
    tn = _pick_tile(N, tn, 128)
    tk = _pick_tile(K, tk, 128)
    grid = (M // tm, N // tn, K // tk)
    return pl.pallas_call(
        _dense_kernel,
        out_shape=jax.ShapeDtypeStruct((M, N), out_dtype),
        grid=grid,
        in_specs=[
            pl.BlockSpec((tm, tk), lambda i, j, k: (i, k)),
            pl.BlockSpec((tk, tn), lambda i, j, k: (k, j)),
            pl.BlockSpec((1, tn), lambda i, j, k: (0, j)),
        ],
        out_specs=pl.BlockSpec((tm, tn), lambda i, j, k: (i, j)),
        scratch_shapes=[pltpu.VMEM((tm, tn), jnp.float32)],
        compiler_params=pltpu.CompilerParams(
            dimension_semantics=("parallel", "parallel", "arbitrary"),
            vmem_limit_bytes=_VMEM_LIMIT),
    )(x, w, b)


# ----------------------------------------------------------------------------
# tiled dense + residual + LayerNorm fused epilogue:
#   out = LN(x @ W + b + residual) * gamma + beta
# (N is kept un-tiled so the LN row reduction is local to the finalize step.)
# ----------------------------------------------------------------------------
def _dense_ln_kernel(x_ref, w_ref, b_ref, r_ref, g_ref, bt_ref, o_ref,
                     acc_ref, *, eps):
    k = pl.program_id(1)

    @pl.when(k == 0)
    def _():
        acc_ref[...] = jnp.zeros_like(acc_ref)

    acc_ref[...] += jnp.dot(x_ref[...], w_ref[...],
                            preferred_element_type=jnp.float32)

    @pl.when(k == pl.num_programs(1) - 1)
    def _():
        y = acc_ref[...] + b_ref[...] + r_ref[...].astype(jnp.float32)
        mean = jnp.mean(y, axis=-1, keepdims=True)
        yc = y - mean
        var = jnp.mean(yc * yc, axis=-1, keepdims=True)
        inv = jax.lax.rsqrt(var + eps)
        o_ref[...] = (yc * inv * g_ref[...] + bt_ref[...]).astype(o_ref.dtype)


def dense_add_ln(x, w, b, residual, gamma, beta, eps=1e-12,
                 out_dtype=jnp.bfloat16, tm=512, tk=1536):
    M, K = x.shape
    K2, N = w.shape
    assert K == K2
    tm = _pick_tile(M, tm, 8)
    tk = _pick_tile(K, tk, 128)
    grid = (M // tm, K // tk)
    return pl.pallas_call(
        functools.partial(_dense_ln_kernel, eps=eps),
        out_shape=jax.ShapeDtypeStruct((M, N), out_dtype),
        grid=grid,
        in_specs=[
            pl.BlockSpec((tm, tk), lambda i, k: (i, k)),
            pl.BlockSpec((tk, N), lambda i, k: (k, 0)),
            pl.BlockSpec((1, N), lambda i, k: (0, 0)),
            pl.BlockSpec((tm, N), lambda i, k: (i, 0)),
            pl.BlockSpec((1, N), lambda i, k: (0, 0)),
            pl.BlockSpec((1, N), lambda i, k: (0, 0)),
        ],
        out_specs=pl.BlockSpec((tm, N), lambda i, k: (i, 0)),
        scratch_shapes=[pltpu.VMEM((tm, N), jnp.float32)],
        compiler_params=pltpu.CompilerParams(
            dimension_semantics=("parallel", "arbitrary"),
            vmem_limit_bytes=_VMEM_LIMIT),
    )(x, w, b, residual, gamma, beta)


# ----------------------------------------------------------------------------
# fully fused FFN:
#   out = LN(gelu(x @ W1 + b1) @ W2 + b2 + residual) * gamma + beta
# The (M, I) intermediate lives only in VMEM; grid loops over I chunks.
# ----------------------------------------------------------------------------
def _ffn_kernel(x_ref, w1_ref, b1_ref, w2_ref, b2_ref, r_ref, g_ref, bt_ref,
                o_ref, acc_ref, *, eps):
    j = pl.program_id(1)

    @pl.when(j == 0)
    def _():
        acc_ref[...] = jnp.zeros_like(acc_ref)

    inter = jnp.dot(x_ref[...], w1_ref[...],
                    preferred_element_type=jnp.float32)
    inter = _gelu(inter + b1_ref[...])
    acc_ref[...] += jnp.dot(inter.astype(w2_ref.dtype), w2_ref[...],
                            preferred_element_type=jnp.float32)

    @pl.when(j == pl.num_programs(1) - 1)
    def _():
        y = acc_ref[...] + b2_ref[...] + r_ref[...].astype(jnp.float32)
        mean = jnp.mean(y, axis=-1, keepdims=True)
        yc = y - mean
        var = jnp.mean(yc * yc, axis=-1, keepdims=True)
        inv = jax.lax.rsqrt(var + eps)
        o_ref[...] = (yc * inv * g_ref[...] + bt_ref[...]).astype(o_ref.dtype)


def ffn_fused(x, w1, b1, w2, b2, residual, gamma, beta, eps=1e-12,
              out_dtype=jnp.bfloat16, tm=512, ti=512):
    M, H = x.shape
    H2, I = w1.shape
    assert H == H2 and w2.shape == (I, H)
    tm = _pick_tile(M, tm, 8)
    ti = _pick_tile(I, ti, 128)
    grid = (M // tm, I // ti)
    return pl.pallas_call(
        functools.partial(_ffn_kernel, eps=eps),
        out_shape=jax.ShapeDtypeStruct((M, H), out_dtype),
        grid=grid,
        in_specs=[
            pl.BlockSpec((tm, H), lambda i, j: (i, 0)),   # x
            pl.BlockSpec((H, ti), lambda i, j: (0, j)),   # W1 chunk
            pl.BlockSpec((1, ti), lambda i, j: (0, j)),   # b1 chunk
            pl.BlockSpec((ti, H), lambda i, j: (j, 0)),   # W2 chunk
            pl.BlockSpec((1, H), lambda i, j: (0, 0)),    # b2
            pl.BlockSpec((tm, H), lambda i, j: (i, 0)),   # residual
            pl.BlockSpec((1, H), lambda i, j: (0, 0)),    # gamma
            pl.BlockSpec((1, H), lambda i, j: (0, 0)),    # beta
        ],
        out_specs=pl.BlockSpec((tm, H), lambda i, j: (i, 0)),
        scratch_shapes=[pltpu.VMEM((tm, H), jnp.float32)],
        compiler_params=pltpu.CompilerParams(
            dimension_semantics=("parallel", "arbitrary"),
            vmem_limit_bytes=_VMEM_LIMIT),
    )(x, w1, b1, w2, b2, residual, gamma, beta)


# ----------------------------------------------------------------------------
# row-tiled LayerNorm (no residual — used for the embeddings)
# ----------------------------------------------------------------------------
def _ln_kernel(x_ref, g_ref, b_ref, o_ref, *, eps):
    x = x_ref[...].astype(jnp.float32)
    mean = jnp.mean(x, axis=-1, keepdims=True)
    xc = x - mean
    var = jnp.mean(xc * xc, axis=-1, keepdims=True)
    inv = jax.lax.rsqrt(var + eps)
    o_ref[...] = (xc * inv * g_ref[...] + b_ref[...]).astype(o_ref.dtype)


def layer_norm(x, gamma, beta, eps=1e-12, out_dtype=jnp.bfloat16, tm=512):
    M, H = x.shape
    tm = _pick_tile(M, tm, 8)
    return pl.pallas_call(
        functools.partial(_ln_kernel, eps=eps),
        out_shape=jax.ShapeDtypeStruct((M, H), out_dtype),
        grid=(M // tm,),
        in_specs=[pl.BlockSpec((tm, H), lambda i: (i, 0)),
                  pl.BlockSpec((1, H), lambda i: (0, 0)),
                  pl.BlockSpec((1, H), lambda i: (0, 0))],
        out_specs=pl.BlockSpec((tm, H), lambda i: (i, 0)),
        compiler_params=pltpu.CompilerParams(
            dimension_semantics=("parallel",),
            vmem_limit_bytes=_VMEM_LIMIT),
    )(x, gamma, beta)


# ----------------------------------------------------------------------------
# flash-style attention core (online softmax, no SxS score materialization)
#   q, k, v : (B*H, S, Dh) bf16   (1/sqrt(Dh) already folded into q)
#   bias    : (B, 1, S)    f32    (additive mask bias, shared across heads)
#   lengths : (B,)         i32    (valid sequence lengths, scalar-prefetched)
# ----------------------------------------------------------------------------
def _flash_attn_kernel(lens_ref, q_ref, k_ref, v_ref, bias_ref, o_ref,
                       m_sc, l_sc, acc_sc, *, n_heads, tk):
    b = pl.program_id(0)
    ki = pl.program_id(2)

    @pl.when(ki == 0)
    def _():
        m_sc[...] = jnp.full_like(m_sc, -1e30)
        l_sc[...] = jnp.zeros_like(l_sc)
        acc_sc[...] = jnp.zeros_like(acc_sc)

    # Skip KV tiles that lie entirely beyond this batch row's valid length.
    @pl.when(ki * tk < lens_ref[b // n_heads])
    def _():
        q = q_ref[0]                    # (tq, Dh) bf16
        k = k_ref[0]                    # (tk, Dh) bf16
        v = v_ref[0]                    # (tk, Dh) bf16
        # Contract over Dh directly (no K transpose / XLU work):
        s = jax.lax.dot_general(q, k, (((1,), (1,)), ((), ())),
                                preferred_element_type=jnp.float32)  # (tq, tk)
        s = s + bias_ref[0]                                          # (1, tk)

        m_prev = m_sc[...]
        m_new = jnp.maximum(m_prev, jnp.max(s, axis=-1, keepdims=True))
        alpha = jnp.exp(m_prev - m_new)
        p = jnp.exp(s - m_new)
        l_sc[...] = alpha * l_sc[...] + jnp.sum(p, axis=-1, keepdims=True)
        acc_sc[...] = alpha * acc_sc[...] + jnp.dot(
            p.astype(v.dtype), v, preferred_element_type=jnp.float32)
        m_sc[...] = m_new

    @pl.when(ki == pl.num_programs(2) - 1)
    def _():
        inv = pl.reciprocal(l_sc[...], approx=True)
        o_ref[0] = (acc_sc[...] * inv).astype(o_ref.dtype)


def flash_attention(q, k, v, bias, lengths, n_heads,
                    out_dtype=jnp.bfloat16, tq=128, tk=256):
    BH, S, Dh = q.shape
    tq = _pick_tile(S, tq, 8)
    tk = _pick_tile(S, tk, 128)
    grid = (BH, S // tq, S // tk)
    kernel = functools.partial(_flash_attn_kernel, n_heads=n_heads, tk=tk)
    return pl.pallas_call(
        kernel,
        out_shape=jax.ShapeDtypeStruct((BH, S, Dh), out_dtype),
        grid_spec=pltpu.PrefetchScalarGridSpec(
            num_scalar_prefetch=1,
            grid=grid,
            in_specs=[
                pl.BlockSpec((1, tq, Dh), lambda b, qi, ki, lens: (b, qi, 0)),
                pl.BlockSpec((1, tk, Dh), lambda b, qi, ki, lens: (b, ki, 0)),
                pl.BlockSpec((1, tk, Dh), lambda b, qi, ki, lens: (b, ki, 0)),
                pl.BlockSpec((1, 1, tk),
                             lambda b, qi, ki, lens: (b // n_heads, 0, ki)),
            ],
            out_specs=pl.BlockSpec((1, tq, Dh),
                                   lambda b, qi, ki, lens: (b, qi, 0)),
            scratch_shapes=[pltpu.VMEM((tq, 1), jnp.float32),
                            pltpu.VMEM((tq, 1), jnp.float32),
                            pltpu.VMEM((tq, Dh), jnp.float32)]),
        compiler_params=pltpu.CompilerParams(
            dimension_semantics=("parallel", "parallel", "arbitrary"),
            vmem_limit_bytes=_VMEM_LIMIT),
    )(lengths, q, k, v, bias)


# ----------------------------------------------------------------------------
# parameter init (deterministic, synthetic — no checkpoint loading)
# Weights are stored in bf16 (MXU inputs); biases / LN params in f32, already
# reshaped to (1, N).  QKV is fused into one (H, 3H) weight and the 1/sqrt(dH)
# attention scale is folded into the Q slice.
# ----------------------------------------------------------------------------
def init_params(key, cfg):
    H, I, L = cfg["hidden"], cfg["intermediate"], cfg["layers"]
    V, P, T = cfg["vocab"], cfg["max_pos"], cfg["type_vocab"]
    nH = cfg["heads"]
    dH = H // nH
    scale = 1.0 / math.sqrt(dH)
    std = 0.02

    def nrm(k, shape):
        return (std * jax.random.normal(k, shape)).astype(jnp.float32)

    keys = jax.random.split(key, 4 + L)
    params = {
        "word_emb": nrm(keys[0], (V, H)),
        "pos_emb": nrm(keys[1], (P, H)),
        "type_emb": nrm(keys[2], (T, H)),
        "emb_ln_g": jnp.ones((1, H), jnp.float32),
        "emb_ln_b": jnp.zeros((1, H), jnp.float32),
        "layers": [],
    }
    for li in range(L):
        lk = jax.random.split(keys[4 + li], 6)
        wq = nrm(lk[0], (H, H)) * scale     # fold 1/sqrt(dH) into Wq
        wk = nrm(lk[1], (H, H))
        wv = nrm(lk[2], (H, H))
        wqkv = jnp.concatenate([wq, wk, wv], axis=1)           # (H, 3H)
        bqkv = jnp.zeros((1, 3 * H), jnp.float32)
        params["layers"].append({
            "wqkv": wqkv.astype(jnp.bfloat16), "bqkv": bqkv,
            "wo": nrm(lk[3], (H, H)).astype(jnp.bfloat16),
            "bo": jnp.zeros((1, H), jnp.float32),
            "attn_ln_g": jnp.ones((1, H), jnp.float32),
            "attn_ln_b": jnp.zeros((1, H), jnp.float32),
            "w1": nrm(lk[4], (H, I)).astype(jnp.bfloat16),
            "b1": jnp.zeros((1, I), jnp.float32),
            "w2": nrm(lk[5], (I, H)).astype(jnp.bfloat16),
            "b2": jnp.zeros((1, H), jnp.float32),
            "ffn_ln_g": jnp.ones((1, H), jnp.float32),
            "ffn_ln_b": jnp.zeros((1, H), jnp.float32),
        })
    return params


# ----------------------------------------------------------------------------
# BertTextEncoder.forward equivalent
#   text: (batch, 3, seq)  -> last_hidden_states: (batch, seq, hidden)
# ----------------------------------------------------------------------------
def bert_text_encoder_forward(params, text, cfg):
    input_ids = text[:, 0, :].astype(jnp.int32)      # .long()
    attn_mask = text[:, 1, :].astype(jnp.float32)    # .float()
    token_type = text[:, 2, :].astype(jnp.int32)     # .long()

    B, S = input_ids.shape
    H = cfg["hidden"]
    nH = cfg["heads"]
    dH = H // nH

    # --- embeddings (gather is glue; LN is a tiled Pallas kernel) -----------
    pos = jnp.arange(S, dtype=jnp.int32)
    emb = (params["word_emb"][input_ids]
           + params["pos_emb"][pos][None, :, :]
           + params["type_emb"][token_type])
    h = layer_norm(emb.reshape(B * S, H),
                   params["emb_ln_g"], params["emb_ln_b"])      # bf16

    # --- extended additive attention mask (deduplicated across heads) -------
    bias = ((1.0 - attn_mask) * -10000.0).reshape(B, 1, S).astype(jnp.float32)
    # valid length per batch row = last valid position + 1 (robust to holes)
    lengths = jnp.max(
        jnp.where(attn_mask > 0.5, jnp.arange(S, dtype=jnp.int32)[None, :] + 1, 0),
        axis=-1).astype(jnp.int32)

    for layer in params["layers"]:
        # fused Q/K/V projection (one matmul over (H, 3H)), bf16 in/out
        qkv = dense(h, layer["wqkv"], layer["bqkv"], out_dtype=jnp.bfloat16)

        # single reshape + transpose splits all heads at once
        qkv_h = (qkv.reshape(B, S, 3, nH, dH)
                     .transpose(2, 0, 3, 1, 4)       # (3, B, nH, S, dH)
                     .reshape(3, B * nH, S, dH))
        q, k, v = qkv_h[0], qkv_h[1], qkv_h[2]        # scale folded into Wq

        # flash attention (online softmax, masked-tile skipping)
        ctx = flash_attention(q, k, v, bias, lengths, nH)   # (B*nH, S, dH) bf16
        attn_in = (ctx.reshape(B, nH, S, dH)
                      .transpose(0, 2, 1, 3)
                      .reshape(B * S, H))                   # (B*S, H) bf16

        # output projection + bias + residual + LayerNorm, fused (bf16 out)
        h = dense_add_ln(attn_in, layer["wo"], layer["bo"], h,
                         layer["attn_ln_g"], layer["attn_ln_b"])

        # fully fused FFN: gelu(x@W1+b1)@W2 + b2 + residual -> LN (bf16 out)
        h = ffn_fused(h, layer["w1"], layer["b1"], layer["w2"], layer["b2"],
                      h, layer["ffn_ln_g"], layer["ffn_ln_b"])

    # single final cast back to f32 for interface parity with torch output
    return h.astype(jnp.float32).reshape(B, S, H)   # last_hidden_states


# ----------------------------------------------------------------------------
if __name__ == "__main__":
    cfg = dict(hidden=32, heads=2, layers=2, intermediate=64,
               vocab=50, max_pos=16, type_vocab=2)
    B, S = 2, 8

    key = jax.random.PRNGKey(0)
    k_ids, k_seg, k_par = jax.random.split(key, 3)

    ids = jax.random.randint(k_ids, (B, S), 0, cfg["vocab"]).astype(jnp.float32)
    segs = jax.random.randint(k_seg, (B, S), 0, cfg["type_vocab"]).astype(jnp.float32)
    mask = jnp.ones((B, S), jnp.float32).at[1, 6:].set(0.0)   # ragged lengths
    text = jnp.stack([ids, mask, segs], axis=1)               # (B, 3, S)

    params = init_params(k_par, cfg)

    out = bert_text_encoder_forward(params, text, cfg)
    out = jax.block_until_ready(out)

    assert out.shape == (B, S, cfg["hidden"])
    assert jnp.all(jnp.isfinite(out))
    print("KERNEL_OK")
</pallas_src>

<mosaic_0001>
module attributes {stable_mosaic.version = 11 : i64} {
  func.func @_ln_kernel(%arg0: i32, %arg1: memref<16x32xf32, #tpu.memory_space<vmem>>, %arg2: memref<1x32xf32, #tpu.memory_space<vmem>>, %arg3: memref<1x32xf32, #tpu.memory_space<vmem>>, %arg4: memref<16x32xbf16, #tpu.memory_space<vmem>>) attributes {dimension_semantics = [#tpu.dimension_semantics<parallel>], iteration_bounds = array<i64: 1>, scalar_prefetch = 0 : i64, scratch_operands = 0 : i64, tpu.core_type = #tpu.core_type<tc>, window_params = [{transform_indices = @transform_0, window_bounds = array<i64: 16, 32>}, {pipeline_mode = #tpu.pipeline_mode<synchronous>, transform_indices = @transform_1, window_bounds = array<i64: 1, 32>}, {pipeline_mode = #tpu.pipeline_mode<synchronous>, transform_indices = @transform_2, window_bounds = array<i64: 1, 32>}, {transform_indices = @transform_3, window_bounds = array<i64: 16, 32>}]} {
    %c0 = arith.constant 0 : index
    %c0_0 = arith.constant 0 : index
    %0 = vector.load %arg1[%c0, %c0_0] : memref<16x32xf32, #tpu.memory_space<vmem>>, vector<16x32xf32>
    %cst = arith.constant dense<0.000000e+00> : vector<16xf32>
    %1 = vector.multi_reduction <add>, %0, %cst [1] : vector<16x32xf32> to vector<16xf32>
    %2 = vector.shape_cast %1 : vector<16xf32> to vector<16x1xf32>
    %cst_1 = arith.constant 3.200000e+01 : f32
    %3 = vector.broadcast %cst_1 : f32 to vector<16x1xf32>
    %4 = arith.divf %2, %3 : vector<16x1xf32>
    %5 = vector.broadcast %4 : vector<16x1xf32> to vector<16x32xf32>
    %6 = arith.subf %0, %5 : vector<16x32xf32>
    %7 = arith.mulf %6, %6 : vector<16x32xf32>
    %cst_2 = arith.constant dense<0.000000e+00> : vector<16xf32>
    %8 = vector.multi_reduction <add>, %7, %cst_2 [1] : vector<16x32xf32> to vector<16xf32>
    %9 = vector.shape_cast %8 : vector<16xf32> to vector<16x1xf32>
    %cst_3 = arith.constant 3.200000e+01 : f32
    %10 = vector.broadcast %cst_3 : f32 to vector<16x1xf32>
    %11 = arith.divf %9, %10 : vector<16x1xf32>
    %cst_4 = arith.constant 9.99999996E-13 : f32
    %12 = vector.broadcast %cst_4 : f32 to vector<16x1xf32>
    %13 = arith.addf %11, %12 : vector<16x1xf32>
    %14 = math.rsqrt %13 : vector<16x1xf32>
    %15 = vector.broadcast %14 : vector<16x1xf32> to vector<16x32xf32>
    %16 = arith.mulf %6, %15 : vector<16x32xf32>
    %c0_5 = arith.constant 0 : index
    %c0_6 = arith.constant 0 : index
    %17 = vector.load %arg2[%c0_5, %c0_6] : memref<1x32xf32, #tpu.memory_space<vmem>>, vector<1x32xf32>
    %18 = vector.broadcast %17 : vector<1x32xf32> to vector<16x32xf32>
    %19 = arith.mulf %16, %18 : vector<16x32xf32>
    %c0_7 = arith.constant 0 : index
    %c0_8 = arith.constant 0 : index
    %20 = vector.load %arg3[%c0_7, %c0_8] : memref<1x32xf32, #tpu.memory_space<vmem>>, vector<1x32xf32>
    %21 = vector.broadcast %20 : vector<1x32xf32> to vector<16x32xf32>
    %22 = arith.addf %19, %21 : vector<16x32xf32>
    %23 = arith.truncf %22 : vector<16x32xf32> to vector<16x32xbf16>
    %c0_9 = arith.constant 0 : index
    %c0_10 = arith.constant 0 : index
    %24 = vector.load %arg4[%c0_9, %c0_10] : memref<16x32xbf16, #tpu.memory_space<vmem>>, vector<16x32xbf16>
    tpu.vector_store %arg4[%c0_9, %c0_10], %23 {strides = array<i32>} : memref<16x32xbf16, #tpu.memory_space<vmem>>, vector<16x32xbf16>,
    return
  }
  func.func @transform_0(%arg0: i32) -> (i32, i32) {
    %c0_i32 = arith.constant 0 : i32
    %c0_i32_0 = arith.constant 0 : i32
    return %arg0, %c0_i32 : i32, i32
  }
  func.func @transform_1(%arg0: i32) -> (i32, i32) {
    %c0_i32 = arith.constant 0 : i32
    %c0_i32_0 = arith.constant 0 : i32
    %c0_i32_1 = arith.constant 0 : i32
    return %c0_i32, %c0_i32_0 : i32, i32
  }
  func.func @transform_2(%arg0: i32) -> (i32, i32) {
    %c0_i32 = arith.constant 0 : i32
    %c0_i32_0 = arith.constant 0 : i32
    %c0_i32_1 = arith.constant 0 : i32
    return %c0_i32, %c0_i32_0 : i32, i32
  }
  func.func @transform_3(%arg0: i32) -> (i32, i32) {
    %c0_i32 = arith.constant 0 : i32
    %c0_i32_0 = arith.constant 0 : i32
    return %arg0, %c0_i32 : i32, i32
  }
}

</mosaic_0001>

<bundles_post_ra>
// kernel: tpu_custom_call.1
= control target key start
LH: loop header
LB: loop body
LE: loop exit
PB: predicated region body
PF: predicated region fallthrough
CT: control target
= control target key end

     0   :  { %8 = vsyncpa [#allocation3], 0  ;;  %s229_s0 = inlined_call_operand.hbm [shape: f32[16,32], index: 0, kind: input, shape index: {}]   ;;  %s230_s1 = inlined_call_operand.vmem [shape: f32[1,32], index: 1, kind: input, shape index: {}]   ;;  %s231_s2 = inlined_call_operand.vmem [shape: f32[1,32], index: 2, kind: input, shape index: {}]   ;;  %s232_s3 = inlined_call_operand.hbm [shape: bf16[16,32], index: 3, kind: output, shape index: {}]  }
   0x1   :  { %9 = vsyncpa [#allocation4], 0  ;;  %s169_s12 = smov [#allocation2]   ;;  %s121_s16 = scalar_lea.hbm %s229_s0, 256 }
   0x2   :  { %s15_s13 = sshll.u32 %s169_s12, 4  ;;  %p122_p0 = scmp.ne.s32.totalorder %s229_s0, %s121_s16  ;;  %s16_s13 = int_to_ptr.vmem [resolvable:$true] %s15_s13 }
   0x3   :  { %p125_p1 = scmp.lt.u32.totalorder %s121_s16, %s229_s0 }
   0x5   :  { %p127_p2 = pnand %p125_p1, %p122_p0 }
   0x7   :  { %130 = shalt.err (!%p127_p2)
}
   0x8   :  { %s131_s21 = scalar_lea.vmem %s16_s13, 256  ;;  %p136_p4 = scmp.lt.s32.totalorder %s16_s13, %s16_s13 }
   0x9   :  { %p132_p3 = scmp.ne.s32.totalorder %s16_s13, %s131_s21  ;;  %p137_p5 = scmp.lt.s32.totalorder %s131_s21, %s131_s21 }
   0xb   :  { %p138_p6 = por %p137_p5, %p136_p4 }
   0xd   :  { %p139_p7 = pnand %p138_p6, %p132_p3 }
   0xf   :  { %142 = shalt.err (!%p139_p7)
}
  0x10   :  { %s170_s22 = smov 128   ;;  %s171_s23 = smov 8  }
  0x11   :  { %21 = dma.hbm_to_vmem [thread:$0]  %s229_s0, 256, %s16_s13, [#allocation3], %s170_s22, %s170_s22, %s171_s23  }
  0x12   :  { %165 = dma.done.wait [#allocation3], 256  }
  0x13   :  { %166 = vsyncadd [#allocation3], 4294967040  ;;  %vm31_vm0 = vcmask 261120   ;;  %v29_v0 = vld [vmem:[#allocation2] sm:$0xff]  ;;  %v30_v1 = vld [vmem:[#allocation2 + $0x8] sm:$0xff]  ;;  %vm85_vm1 = vcmask 257024  }
  0x14   :  { %v32_v2 = vsel %vm31_vm0, %v29_v0, 0.0  ;;  %v35_v3 = vsel %vm31_vm0, %v30_v1, 0.0  ;;  %v105_v21 = vld [vmem:[%s230_s1] ss:$0 sm:$0xff]  ;;  %s172_s29 = smov [#allocation5]  }
  0x15   :  { %33 = vadd.xlane.f32.xlu0 %v32_v2  ;;  %v106_v23 = vld [vmem:[%s231_s2] ss:$0 sm:$0xff]  ;;  %s93_s30 = sshll.u32 %s172_s29, 4  ;;  %s94_s30 = int_to_ptr.vmem [resolvable:$true] %s93_s30 }
  0x16   :  { %s143_s1 = scalar_lea.vmem %s94_s30, 128  ;;  %p148_p9 = scmp.lt.s32.totalorder %s94_s30, %s94_s30 }
  0x17   :  { %p144_p8 = scmp.ne.s32.totalorder %s94_s30, %s143_s1  ;;  %p149_p10 = scmp.lt.s32.totalorder %s143_s1, %s143_s1 }
  0x19   :  { %36 = vadd.xlane.f32.xlu0 %v35_v3  ;;  %p150_p11 = por %p149_p10, %p148_p9 }
  0x1b   :  { %p151_p12 = pnand %p150_p11, %p144_p8 }
  0xa2   :  { %v34_v4 = vpop.xlane.xlu0 %33 }
  0xa3   :  { %v39_v5 = vmul.f32 0.03125, %v34_v4 }
  0xa5   :  { %v41_v6 = vsub.f32 %v29_v0, %v39_v5 }
  0xa6   :  { %v37_v7 = vpop.xlane.xlu0 %36 }
  0xa7   :  { %v40_v8 = vmul.f32 0.03125, %v37_v7  ;;  %v43_v9 = vmul.f32 %v41_v6, %v41_v6 }
  0xa9   :  { %v42_v10 = vsub.f32 %v30_v1, %v40_v8  ;;  %v45_v11 = vsel %vm31_vm0, %v43_v9, 0.0 }
  0xaa   :  { %46 = vadd.xlane.f32.xlu1 %v45_v11 }
  0xab   :  { %v44_v12 = vmul.f32 %v42_v10, %v42_v10 }
  0xad   :  { %v48_v13 = vsel %vm31_vm0, %v44_v12, 0.0 }
  0xae   :  { %49 = vadd.xlane.f32.xlu1 %v48_v13 }
 0x137   :  { %v47_v14 = vpop.xlane.xlu1 %46 }
 0x138   :  { %v51_v15 = vmul.f32 0.03125, %v47_v14 }
 0x13a   :  { %v53_v16 = vadd.f32 1e-12, %v51_v15 }
 0x13b   :  { %v50_v17 = vpop.xlane.xlu1 %49 }
 0x13c   :  { %117 = vrsqrt.f32 %v53_v16  ;;  %v52_v18 = vmul.f32 0.03125, %v50_v17 }
 0x13e   :  { %v54_v19 = vadd.f32 1e-12, %v52_v18 }
 0x140   :  { %119 = vrsqrt.f32 %v54_v19 }
 0x146   :  { %v118_v20 = vpop.eup %117 }
 0x147   :  { %v57_v22 = vmul.f32 %v118_v20, %v41_v6 }
 0x149   :  { %v66_v24 = vmul.f32 %v105_v21, %v57_v22 }
 0x14a   :  { %v120_v25 = vpop.eup %119 }
 0x14b   :  { %v58_v26 = vmul.f32 %v120_v25, %v42_v10  ;;  %v75_v27 = vadd.f32 %v106_v23, %v66_v24 }
 0x14d   :  { %v67_v28 = vmul.f32 %v105_v21, %v58_v26  ;;  %v109_v29 = vpack.c.bf16 %v75_v27, %v75_v27 }
 0x14f   :  { %v76_v30 = vadd.f32 %v106_v23, %v67_v28  ;;  %86 = vst.msk [vmem:[#allocation5] sm:$0xf] %vm85_vm1, %v109_v29 }
 0x151   :  { %v110_v31 = vpack.c.bf16 %v76_v30, %v76_v30 }
 0x153   :  { %87 = vst.msk [vmem:[#allocation5 + $0x4] sm:$0xf] %vm85_vm1, %v110_v31 }
 0x154   :  { %154 = shalt.err (!%p151_p12)
}
 0x155   :  { %s155_s5 = scalar_lea.hbm %s232_s3, 128 }
 0x156   :  { %p156_p13 = scmp.ne.s32.totalorder %s232_s3, %s155_s5  ;;  %p159_p0 = scmp.lt.u32.totalorder %s155_s5, %s232_s3 }
 0x158   :  { %p161_p1 = pnand %p159_p0, %p156_p13 }
 0x15a   :  { %164 = shalt.err (!%p161_p1)
}
 0x15b   :  { %s173_s10 = smov 64   ;;  %s174_s11 = smov 4  }
 0x15c   :  { %99 = dma.vmem_to_hbm [thread:$0]  %s94_s30, 128, %s232_s3, [#allocation4], %s173_s10, %s173_s10, %s174_s11  }
 0x15d   :  { %167 = dma.done.wait [#allocation4], 128  }
 0x15e   :  { %168 = vsyncadd [#allocation4], 4294967168 }
 0x15f   :  { %103 = vsyncpa [#allocation3], 1 }
 0x160   :  { %104 = vsyncpa [#allocation4], 1 }

</bundles_post_ra>
